<compile_context>
chip_gen: v7x
topology: tpu7x:2x2x1
jax: 0.10.0
libtpu: 0.0.40
codegen_flags: <defaults>
</compile_context>

<pallas_src>
import jax
import jax.numpy as jnp
from jax.experimental import pallas as pl
from jax.experimental.pallas import tpu as pltpu

LANE = 128


def _round_up(v, m):
    return ((v + m - 1) // m) * m


def dqn_mlp_kernel(x_ref, w1_ref, b1_ref, w2_ref, b2_ref, w3_ref, b3_ref, o_ref):
    # Layer 1: Linear + ReLU.  MXU consumes the (possibly bf16) operands and
    # accumulates in f32; bias-add / ReLU stay in f32.
    h1 = jnp.dot(x_ref[...], w1_ref[...], preferred_element_type=jnp.float32)
    h1 = jnp.maximum(h1 + b1_ref[...], 0.0)
    # Layer 2: Linear + ReLU.
    h2 = jnp.dot(h1.astype(w2_ref.dtype), w2_ref[...],
                 preferred_element_type=jnp.float32)
    h2 = jnp.maximum(h2 + b2_ref[...], 0.0)
    # Layer 3: Linear (no activation).  Output lanes are padded to 128 so the
    # store is lane-dense (unmasked vst); dtype follows o_ref (bf16 in the
    # bf16 path to halve the writeback stream).
    out = jnp.dot(h2.astype(w3_ref.dtype), w3_ref[...],
                  preferred_element_type=jnp.float32)
    o_ref[...] = (out + b3_ref[...]).astype(o_ref.dtype)


def dqn_forward(x, params, *, tb=1024, use_bf16=True):
    """Fused forward pass of DQNNetwork.

    x: (batch, observation_dim) float32
    params: dict with w1 (obs,64), b1 (1,64), w2 (64,64), b2 (1,64),
            w3 (64,action), b3 (1,action)
    returns: (batch, action_dim) float32 Q-values
    """
    w1, b1 = params["w1"], params["b1"]
    w2, b2 = params["w2"], params["b2"]
    w3, b3 = params["w3"], params["b3"]
    batch, obs_dim = x.shape
    hidden = w1.shape[1]
    action_dim = w3.shape[1]

    mm_dtype = jnp.bfloat16 if use_bf16 else jnp.float32
    out_dtype = jnp.bfloat16 if use_bf16 else jnp.float32
    sub = 16 if use_bf16 else 8  # sublane packing of the matmul/output dtype

    # --- Lane-dense output: pad the final projection to a multiple of 128. ---
    n_pad = max(LANE, _round_up(action_dim, LANE))
    w3_p = jnp.zeros((hidden, n_pad), w3.dtype).at[:, :action_dim].set(w3)
    b3_p = jnp.zeros((1, n_pad), b3.dtype).at[:, :action_dim].set(b3)

    # --- Batch tiling -------------------------------------------------------
    # Multiple of `sub` sublanes; capped so the grid has >= 2 steps whenever
    # the batch allows it (v7x has 2 TensorCores); hard-capped at 8192 so the
    # VMEM estimate below stays sane.
    batch_aligned = _round_up(batch, sub)
    tb_two_steps = _round_up(pl.cdiv(batch_aligned, 2), sub)
    tb = min(tb, tb_two_steps, 8192)
    tb = max(sub, (tb // sub) * sub)
    batch_p = _round_up(batch, tb)
    if batch_p != batch:
        x = jnp.pad(x, ((0, batch_p - batch), (0, 0)))
    grid = (batch_p // tb,)

    # --- bf16 matmul operands halve HBM->VMEM DMA bytes; accumulation in f32.
    x_mm = x.astype(mm_dtype)
    w1_mm = w1.astype(mm_dtype)
    w2_mm = w2.astype(mm_dtype)
    w3_mm = w3_p.astype(mm_dtype)
    b1_f = b1.astype(jnp.float32)
    b2_f = b2.astype(jnp.float32)
    b3_f = b3_p.astype(jnp.float32)

    in_bytes = jnp.dtype(mm_dtype).itemsize
    out_bytes = jnp.dtype(out_dtype).itemsize

    # --- Conservative per-step VMEM estimate; raise the scoped limit only if a
    # big tile would overflow v5e's 16 MiB default (cap stays < v7x's 64 MiB).
    vmem_est = (
        2 * tb * obs_dim * in_bytes                                  # x tile (x2 buf)
        + 2 * tb * n_pad * out_bytes                                 # out tile (x2 buf)
        + 2 * ((obs_dim + hidden) * hidden + hidden * n_pad) * in_bytes  # weights
        + 2 * (2 * hidden + n_pad) * 4                               # biases (f32)
        + tb * (2 * hidden + n_pad) * 4                              # f32 h1/h2/out temps
    )
    compiler_kwargs = dict(dimension_semantics=("parallel",))
    if vmem_est > 12 * 1024 * 1024:
        compiler_kwargs["vmem_limit_bytes"] = int(
            min(vmem_est * 1.5 + (4 << 20), 48 << 20))

    tile = lambda i: (i, 0)     # x / out tiles march over the batch
    const = lambda i: (0, 0)    # weights & biases stay resident in VMEM

    flops = 2 * batch_p * (obs_dim * hidden + hidden * hidden + hidden * n_pad)
    bytes_accessed = (
        x_mm.size * in_bytes
        + sum(a.size * a.dtype.itemsize
              for a in (w1_mm, w2_mm, w3_mm, b1_f, b2_f, b3_f))
        + batch_p * n_pad * out_bytes)

    out = pl.pallas_call(
        dqn_mlp_kernel,
        out_shape=jax.ShapeDtypeStruct((batch_p, n_pad), out_dtype),
        grid_spec=pltpu.PrefetchScalarGridSpec(
            num_scalar_prefetch=0,
            grid=grid,
            in_specs=[
                pl.BlockSpec((tb, obs_dim), tile),       # x tile
                pl.BlockSpec((obs_dim, hidden), const),  # w1 (resident)
                pl.BlockSpec((1, hidden), const),        # b1
                pl.BlockSpec((hidden, hidden), const),   # w2
                pl.BlockSpec((1, hidden), const),        # b2
                pl.BlockSpec((hidden, n_pad), const),    # w3 (lane-padded)
                pl.BlockSpec((1, n_pad), const),         # b3 (lane-padded)
            ],
            out_specs=pl.BlockSpec((tb, n_pad), tile),
        ),
        compiler_params=pltpu.CompilerParams(**compiler_kwargs),
        cost_estimate=pl.CostEstimate(
            flops=flops, transcendentals=0, bytes_accessed=bytes_accessed),
    )(x_mm, w1_mm, b1_f, w2_mm, b2_f, w3_mm, b3_f)

    # Slice away batch padding + lane padding; always return f32 Q-values.
    return out[:batch, :action_dim].astype(jnp.float32)


def init_params(key, observation_dim, action_dim, hidden=64):
    """Deterministic parameter init (PyTorch-style uniform fan-in bounds)."""
    ks = jax.random.split(key, 6)

    def lin(kw, kb, fan_in, fan_out):
        bound = 1.0 / jnp.sqrt(jnp.float32(fan_in))
        w = jax.random.uniform(kw, (fan_in, fan_out), jnp.float32, -bound, bound)
        b = jax.random.uniform(kb, (1, fan_out), jnp.float32, -bound, bound)
        return w, b

    w1, b1 = lin(ks[0], ks[1], observation_dim, hidden)
    w2, b2 = lin(ks[2], ks[3], hidden, hidden)
    w3, b3 = lin(ks[4], ks[5], hidden, action_dim)
    return {"w1": w1, "b1": b1, "w2": w2, "b2": b2, "w3": w3, "b3": b3}


def dqn_forward_ref(x, p):
    """Pure-JAX reference for correctness check."""
    h = jnp.maximum(x @ p["w1"] + p["b1"], 0.0)
    h = jnp.maximum(h @ p["w2"] + p["b2"], 0.0)
    return h @ p["w3"] + p["b3"]


def _assert_confident_argmax_agrees(q_test, q_ref, margin=0.1):
    """Greedy-action check: rows whose top-2 reference gap exceeds `margin`
    must pick the same action in the test output (bf16 noise is << margin)."""
    top2 = jnp.sort(q_ref, axis=-1)
    confident = (top2[:, -1] - top2[:, -2]) > margin
    same = jnp.argmax(q_test, axis=-1) == jnp.argmax(q_ref, axis=-1)
    assert bool(jnp.all(jnp.where(confident, same, True))), \
        "bf16 path flipped argmax on a confidently-separated row"


if __name__ == "__main__":
    observation_dim = 16
    action_dim = 4

    key = jax.random.PRNGKey(0)
    kx_small, kx_big, kp = jax.random.split(key, 3)
    params = init_params(kp, observation_dim, action_dim)

    # Two batch sizes: tiny (single grid step) and one that exercises batch
    # padding + the >=2-step parallel grid.
    for batch, kx in ((8, kx_small), (300, kx_big)):
        x = jax.random.normal(kx, (batch, observation_dim), jnp.float32)
        ref = dqn_forward_ref(x, params)

        # f32-operand path: tight tolerance vs the pure-JAX reference.
        out_f32 = jax.block_until_ready(dqn_forward(x, params, use_bf16=False))
        assert out_f32.shape == (batch, action_dim)
        assert jnp.allclose(out_f32, ref, atol=1e-5, rtol=1e-5), \
            f"f32 mismatch vs reference (batch={batch})"

        # bf16-operand path (default; halves input DMA and output writeback).
        out_bf16 = jax.block_until_ready(dqn_forward(x, params, use_bf16=True))
        assert out_bf16.shape == (batch, action_dim)
        assert out_bf16.dtype == jnp.float32
        assert jnp.allclose(out_bf16, ref, atol=5e-2, rtol=5e-2), \
            f"bf16 mismatch vs reference (batch={batch})"
        _assert_confident_argmax_agrees(out_bf16, ref)

    print("KERNEL_OK")
</pallas_src>

<mosaic_0001>
module attributes {stable_mosaic.version = 11 : i64} {
  func.func @dqn_mlp_kernel(%arg0: i32, %arg1: memref<8x16xf32, #tpu.memory_space<vmem>>, %arg2: memref<16x64xf32, #tpu.memory_space<vmem>>, %arg3: memref<1x64xf32, #tpu.memory_space<vmem>>, %arg4: memref<64x64xf32, #tpu.memory_space<vmem>>, %arg5: memref<1x64xf32, #tpu.memory_space<vmem>>, %arg6: memref<64x128xf32, #tpu.memory_space<vmem>>, %arg7: memref<1x128xf32, #tpu.memory_space<vmem>>, %arg8: memref<8x128xf32, #tpu.memory_space<vmem>>) attributes {dimension_semantics = [#tpu.dimension_semantics<parallel>], iteration_bounds = array<i64: 1>, scalar_prefetch = 0 : i64, scratch_operands = 0 : i64, tpu.core_type = #tpu.core_type<tc>, window_params = [{transform_indices = @transform_0, window_bounds = array<i64: 8, 16>}, {pipeline_mode = #tpu.pipeline_mode<synchronous>, transform_indices = @transform_1, window_bounds = array<i64: 16, 64>}, {pipeline_mode = #tpu.pipeline_mode<synchronous>, transform_indices = @transform_2, window_bounds = array<i64: 1, 64>}, {pipeline_mode = #tpu.pipeline_mode<synchronous>, transform_indices = @transform_3, window_bounds = array<i64: 64, 64>}, {pipeline_mode = #tpu.pipeline_mode<synchronous>, transform_indices = @transform_4, window_bounds = array<i64: 1, 64>}, {pipeline_mode = #tpu.pipeline_mode<synchronous>, transform_indices = @transform_5, window_bounds = array<i64: 64, 128>}, {pipeline_mode = #tpu.pipeline_mode<synchronous>, transform_indices = @transform_6, window_bounds = array<i64: 1, 128>}, {transform_indices = @transform_7, window_bounds = array<i64: 8, 128>}]} {
    %c0 = arith.constant 0 : index
    %c0_0 = arith.constant 0 : index
    %0 = vector.load %arg1[%c0, %c0_0] : memref<8x16xf32, #tpu.memory_space<vmem>>, vector<8x16xf32>
    %c0_1 = arith.constant 0 : index
    %c0_2 = arith.constant 0 : index
    %1 = vector.load %arg2[%c0_1, %c0_2] : memref<16x64xf32, #tpu.memory_space<vmem>>, vector<16x64xf32>
    %cst = arith.constant dense<0.000000e+00> : vector<8x64xf32>
    %2 = tpu.matmul %0, %1, %cst {dimension_numbers = #tpu.dot_dimension_numbers<[1], [0], [0], [1], [0, 0, 1, 1], [], []>} : vector<8x16xf32>, vector<16x64xf32>, vector<8x64xf32> -> vector<8x64xf32>
    %c0_3 = arith.constant 0 : index
    %c0_4 = arith.constant 0 : index
    %3 = vector.load %arg3[%c0_3, %c0_4] : memref<1x64xf32, #tpu.memory_space<vmem>>, vector<1x64xf32>
    %4 = vector.broadcast %3 : vector<1x64xf32> to vector<8x64xf32>
    %5 = arith.addf %2, %4 : vector<8x64xf32>
    %cst_5 = arith.constant 0.000000e+00 : f32
    %6 = vector.broadcast %cst_5 : f32 to vector<8x64xf32>
    %7 = arith.maximumf %5, %6 : vector<8x64xf32>
    %c0_6 = arith.constant 0 : index
    %c0_7 = arith.constant 0 : index
    %8 = vector.load %arg4[%c0_6, %c0_7] : memref<64x64xf32, #tpu.memory_space<vmem>>, vector<64x64xf32>
    %cst_8 = arith.constant dense<0.000000e+00> : vector<8x64xf32>
    %9 = tpu.matmul %7, %8, %cst_8 {dimension_numbers = #tpu.dot_dimension_numbers<[1], [0], [0], [1], [0, 0, 1, 1], [], []>} : vector<8x64xf32>, vector<64x64xf32>, vector<8x64xf32> -> vector<8x64xf32>
    %c0_9 = arith.constant 0 : index
    %c0_10 = arith.constant 0 : index
    %10 = vector.load %arg5[%c0_9, %c0_10] : memref<1x64xf32, #tpu.memory_space<vmem>>, vector<1x64xf32>
    %11 = vector.broadcast %10 : vector<1x64xf32> to vector<8x64xf32>
    %12 = arith.addf %9, %11 : vector<8x64xf32>
    %cst_11 = arith.constant 0.000000e+00 : f32
    %13 = vector.broadcast %cst_11 : f32 to vector<8x64xf32>
    %14 = arith.maximumf %12, %13 : vector<8x64xf32>
    %c0_12 = arith.constant 0 : index
    %c0_13 = arith.constant 0 : index
    %15 = vector.load %arg6[%c0_12, %c0_13] : memref<64x128xf32, #tpu.memory_space<vmem>>, vector<64x128xf32>
    %cst_14 = arith.constant dense<0.000000e+00> : vector<8x128xf32>
    %16 = tpu.matmul %14, %15, %cst_14 {dimension_numbers = #tpu.dot_dimension_numbers<[1], [0], [0], [1], [0, 0, 1, 1], [], []>} : vector<8x64xf32>, vector<64x128xf32>, vector<8x128xf32> -> vector<8x128xf32>
    %c0_15 = arith.constant 0 : index
    %c0_16 = arith.constant 0 : index
    %17 = vector.load %arg7[%c0_15, %c0_16] : memref<1x128xf32, #tpu.memory_space<vmem>>, vector<1x128xf32>
    %18 = vector.broadcast %17 : vector<1x128xf32> to vector<8x128xf32>
    %19 = arith.addf %16, %18 : vector<8x128xf32>
    %c0_17 = arith.constant 0 : index
    %c0_18 = arith.constant 0 : index
    %20 = vector.load %arg8[%c0_17, %c0_18] : memref<8x128xf32, #tpu.memory_space<vmem>>, vector<8x128xf32>
    tpu.vector_store %arg8[%c0_17, %c0_18], %19 {strides = array<i32>} : memref<8x128xf32, #tpu.memory_space<vmem>>, vector<8x128xf32>,
    return
  }
  func.func @transform_0(%arg0: i32) -> (i32, i32) {
    %c0_i32 = arith.constant 0 : i32
    %c0_i32_0 = arith.constant 0 : i32
    return %arg0, %c0_i32 : i32, i32
  }
  func.func @transform_1(%arg0: i32) -> (i32, i32) {
    %c0_i32 = arith.constant 0 : i32
    %c0_i32_0 = arith.constant 0 : i32
    %c0_i32_1 = arith.constant 0 : i32
    return %c0_i32, %c0_i32_0 : i32, i32
  }
  func.func @transform_2(%arg0: i32) -> (i32, i32) {
    %c0_i32 = arith.constant 0 : i32
    %c0_i32_0 = arith.constant 0 : i32
    %c0_i32_1 = arith.constant 0 : i32
    return %c0_i32, %c0_i32_0 : i32, i32
  }
  func.func @transform_3(%arg0: i32) -> (i32, i32) {
    %c0_i32 = arith.constant 0 : i32
    %c0_i32_0 = arith.constant 0 : i32
    %c0_i32_1 = arith.constant 0 : i32
    return %c0_i32, %c0_i32_0 : i32, i32
  }
  func.func @transform_4(%arg0: i32) -> (i32, i32) {
    %c0_i32 = arith.constant 0 : i32
    %c0_i32_0 = arith.constant 0 : i32
    %c0_i32_1 = arith.constant 0 : i32
    return %c0_i32, %c0_i32_0 : i32, i32
  }
  func.func @transform_5(%arg0: i32) -> (i32, i32) {
    %c0_i32 = arith.constant 0 : i32
    %c0_i32_0 = arith.constant 0 : i32
    %c0_i32_1 = arith.constant 0 : i32
    return %c0_i32, %c0_i32_0 : i32, i32
  }
  func.func @transform_6(%arg0: i32) -> (i32, i32) {
    %c0_i32 = arith.constant 0 : i32
    %c0_i32_0 = arith.constant 0 : i32
    %c0_i32_1 = arith.constant 0 : i32
    return %c0_i32, %c0_i32_0 : i32, i32
  }
  func.func @transform_7(%arg0: i32) -> (i32, i32) {
    %c0_i32 = arith.constant 0 : i32
    %c0_i32_0 = arith.constant 0 : i32
    return %arg0, %c0_i32 : i32, i32
  }
}

</mosaic_0001>

<bundles_post_ra>
// kernel: tpu_custom_call.1
= control target key start
LH: loop header
LB: loop body
LE: loop exit
PB: predicated region body
PF: predicated region fallthrough
CT: control target
= control target key end

     0   :  { %12 = vsyncpa [#allocation3], 0  ;;  %s719_s0 = inlined_call_operand.hbm [shape: f32[8,16], index: 0, kind: input, shape index: {}]   ;;  %s720_s1 = inlined_call_operand.hbm [shape: f32[16,64], index: 1, kind: input, shape index: {}]   ;;  %s721_s2 = inlined_call_operand.vmem [shape: f32[1,64], index: 2, kind: input, shape index: {}]   ;;  %s722_s3 = inlined_call_operand.hbm [shape: f32[64,64], index: 3, kind: input, shape index: {}]   ;;  %s723_s4 = inlined_call_operand.vmem [shape: f32[1,64], index: 4, kind: input, shape index: {}]   ;;  %s724_s5 = inlined_call_operand.hbm [shape: f32[64,128], index: 5, kind: input, shape index: {}]   ;;  %s725_s6 = inlined_call_operand.vmem [shape: f32[1,128], index: 6, kind: input, shape index: {}]   ;;  %s726_s7 = inlined_call_operand.hbm [shape: f32[8,128], index: 7, kind: output, shape index: {}]  }
   0x1   :  { %13 = vsyncpa [#allocation6], 0 }
   0x2   :  { %14 = vsyncpa [#allocation9], 0 }
   0x3   :  { %15 = vsyncpa [#allocation4], 0  ;;  %s588_s24 = smov [#allocation5]   ;;  %s470_s28 = scalar_lea.hbm %s720_s1, 256 }
   0x4   :  { %s31_s25 = sshll.u32 %s588_s24, 4  ;;  %p471_p0 = scmp.ne.s32.totalorder %s720_s1, %s470_s28  ;;  %s32_s25 = int_to_ptr.vmem [resolvable:$true] %s31_s25 }
   0x5   :  { %p474_p1 = scmp.lt.u32.totalorder %s470_s28, %s720_s1 }
   0x7   :  { %p476_p2 = pnand %p474_p1, %p471_p0 }
   0x9   :  { %479 = shalt.err (!%p476_p2)
}
   0xa   :  { %s480_s10 = scalar_lea.vmem %s32_s25, 256  ;;  %p485_p4 = scmp.lt.s32.totalorder %s32_s25, %s32_s25 }
   0xb   :  { %p481_p3 = scmp.ne.s32.totalorder %s32_s25, %s480_s10  ;;  %p486_p5 = scmp.lt.s32.totalorder %s480_s10, %s480_s10 }
   0xd   :  { %p487_p6 = por %p486_p5, %p485_p4 }
   0xf   :  { %p488_p7 = pnand %p487_p6, %p481_p3 }
  0x11   :  { %491 = shalt.err (!%p488_p7)
}
  0x12   :  { %s589_s11 = smov 128   ;;  %s590_s12 = smov 8  }
  0x13   :  { %37 = dma.hbm_to_vmem [thread:$0]  %s720_s1, 256, %s32_s25, [#allocation6], %s589_s11, %s589_s11, %s590_s12  }
  0x14   :  { %s591_s15 = smov [#allocation2]   ;;  %s592_s17 = smov [#allocation7]  }
  0x15   :  { %s22_s16 = sshll.u32 %s591_s15, 4  ;;  %s45_s18 = sshll.u32 %s592_s17, 4  ;;  %s23_s16 = int_to_ptr.vmem [resolvable:$true] %s22_s16  ;;  %s46_s18 = int_to_ptr.vmem [resolvable:$true] %s45_s18 }
  0x16   :  { %s492_s21 = scalar_lea.hbm %s719_s0, 128 }
  0x17   :  { %p493_p8 = scmp.ne.s32.totalorder %s719_s0, %s492_s21  ;;  %p496_p9 = scmp.lt.u32.totalorder %s492_s21, %s719_s0 }
  0x19   :  { %p498_p10 = pnand %p496_p9, %p493_p8 }
  0x1b   :  { %501 = shalt.err (!%p498_p10)
}
  0x1c   :  { %s502_s1 = scalar_lea.vmem %s23_s16, 128  ;;  %p507_p12 = scmp.lt.s32.totalorder %s23_s16, %s23_s16 }
  0x1d   :  { %p503_p11 = scmp.ne.s32.totalorder %s23_s16, %s502_s1  ;;  %p508_p13 = scmp.lt.s32.totalorder %s502_s1, %s502_s1 }
  0x1f   :  { %p509_p0 = por %p508_p13, %p507_p12 }
  0x21   :  { %p510_p1 = pnand %p509_p0, %p503_p11 }
  0x23   :  { %513 = shalt.err (!%p510_p1)
}
  0x24   :  { %25 = dma.hbm_to_vmem [thread:$0]  %s719_s0, 128, %s23_s16, [#allocation3]  }
  0x25   :  { %s514_s30 = scalar_lea.hbm %s722_s3, 1024 }
  0x26   :  { %p515_p2 = scmp.ne.s32.totalorder %s722_s3, %s514_s30  ;;  %p518_p3 = scmp.lt.u32.totalorder %s514_s30, %s722_s3 }
  0x28   :  { %p520_p4 = pnand %p518_p3, %p515_p2 }
  0x2a   :  { %523 = shalt.err (!%p520_p4)
}
  0x2b   :  { %s524_s14 = scalar_lea.vmem %s46_s18, 1024  ;;  %p529_p6 = scmp.lt.s32.totalorder %s46_s18, %s46_s18 }
  0x2c   :  { %p525_p5 = scmp.ne.s32.totalorder %s46_s18, %s524_s14  ;;  %p530_p7 = scmp.lt.s32.totalorder %s524_s14, %s524_s14 }
  0x2e   :  { %p531_p8 = por %p530_p7, %p529_p6 }
  0x30   :  { %p532_p9 = pnand %p531_p8, %p525_p5 }
  0x32   :  { %535 = shalt.err (!%p532_p9)
}
  0x33   :  { %51 = dma.hbm_to_vmem [thread:$0]  %s722_s3, 1024, %s46_s18, [#allocation6], %s589_s11, %s589_s11, %s590_s12  }
  0x34   :  { %s593_s16 = smov [#allocation8]   ;;  %s536_s21 = scalar_lea.hbm %s724_s5, 1024 }
  0x35   :  { %s59_s17 = sshll.u32 %s593_s16, 4  ;;  %p537_p10 = scmp.ne.s32.totalorder %s724_s5, %s536_s21  ;;  %s60_s17 = int_to_ptr.vmem [resolvable:$true] %s59_s17 }
  0x36   :  { %p540_p11 = scmp.lt.u32.totalorder %s536_s21, %s724_s5 }
  0x38   :  { %p542_p12 = pnand %p540_p11, %p537_p10 }
  0x3a   :  { %545 = shalt.err (!%p542_p12)
}
  0x3b   :  { %s546_s1 = scalar_lea.vmem %s60_s17, 1024  ;;  %p551_p0 = scmp.lt.s32.totalorder %s60_s17, %s60_s17 }
  0x3c   :  { %p547_p13 = scmp.ne.s32.totalorder %s60_s17, %s546_s1  ;;  %p552_p1 = scmp.lt.s32.totalorder %s546_s1, %s546_s1 }
  0x3e   :  { %p553_p2 = por %p552_p1, %p551_p0 }
  0x40   :  { %p554_p3 = pnand %p553_p2, %p547_p13 }
  0x42   :  { %557 = shalt.err (!%p554_p3)
}
  0x43   :  { %65 = dma.hbm_to_vmem [thread:$0]  %s724_s5, 1024, %s60_s17, [#allocation9], %s589_s11, %s589_s11, %s590_s12  }
  0x44   :  { %580 = dma.done.wait [#allocation3], 128  }
  0x45   :  { %581 = vsyncadd [#allocation3], 4294967168 }
  0x46   :  { %582 = dma.done.wait [#allocation6], 1280  }
  0x47   :  { %583 = vsyncadd [#allocation6], 4294966016 }
  0x48   :  { %584 = dma.done.wait [#allocation9], 1024  }
  0x49   :  { %585 = vsyncadd [#allocation9], 4294966272  ;;  %v594_v0 = vmov 0.0|0.0   ;;  %vm595_vm0 = vmmov 0   ;;  %v596_v1 = vmov 0.0   ;;  %v81_v2 = vld [vmem:[#allocation5] sm:$0xff] }
  0x4a   :  { %433 = vmatprep.subr.bf16.mxu0 %v594_v0  ;;  %392 = vmatprep.mubr.msk.f32.mxu0 %vm595_vm0, %v596_v1  ;;  %v82_v3 = vld [vmem:[#allocation5 + $0x8] sm:$0xff]  ;;  %v165_v5 = vld [vmem:[#allocation7] sm:$0xff]  ;;  %v166_v6 = vld [vmem:[#allocation7 + $0x8] sm:$0xff]  ;;  %vm90_vm1 = vcmask 130048   ;;  %vm180_vm2 = vcmask 523264   ;;  %s597_s28 = smov [#allocation10]  }
  0x4b   :  { %436 = vmatprep.subr.bf16.mxu1 %v594_v0  ;;  %411 = vmatprep.mubr.msk.f32.mxu1 %vm595_vm0, %v596_v1  ;;  %v434_v4 = vpack.c.bf16 %v82_v3, %v81_v2  ;;  %v167_v7 = vld [vmem:[#allocation7 + $0x10] sm:$0xff]  ;;  %v437_v8 = vpack.c.bf16 %v166_v6, %v165_v5  ;;  %v168_v9 = vld [vmem:[#allocation7 + $0x18] sm:$0xff]  ;;  %v80_v10 = vld [vmem:[#allocation2] sm:$0xff]  ;;  %s350_s29 = sshll.u32 %s597_s28, 4  ;;  %s351_s29 = int_to_ptr.vmem [resolvable:$true] %s350_s29 }
  0x4c   :  { %v440_v11 = vpack.c.bf16 %v168_v9, %v167_v7  ;;  %v169_v12 = vld [vmem:[#allocation7 + $0x20] sm:$0xff]  ;;  %v170_v13 = vld [vmem:[#allocation7 + $0x28] sm:$0xff]  ;;  %v171_v15 = vld [vmem:[#allocation7 + $0x30] sm:$0xff]  ;;  %s558_s30 = scalar_lea.vmem %s351_s29, 128  ;;  %p563_p5 = scmp.lt.s32.totalorder %s351_s29, %s351_s29 }
  0x4d   :  { %435 = vmatpush3.bf16.msra.mxu0 %v434_v4  ;;  %438 = vmatpush3.bf16.msra.mxu1 %v437_v8  ;;  %v443_v14 = vpack.c.bf16 %v170_v13, %v169_v12  ;;  %v172_v16 = vld [vmem:[#allocation7 + $0x38] sm:$0xff]  ;;  %v255_v18 = vld [vmem:[#allocation8] sm:$0xff]  ;;  %v256_v19 = vld [vmem:[#allocation8 + $0x8] sm:$0xff]  ;;  %p559_p4 = scmp.ne.s32.totalorder %s351_s29, %s558_s30  ;;  %p564_p6 = scmp.lt.s32.totalorder %s558_s30, %s558_s30 }
  0x4e   :  { %448 = vmatprep.subr.bf16.mxu0 %v594_v0  ;;  %439 = vmatprep.subr.bf16.mxu1 %v594_v0  ;;  %v446_v17 = vpack.c.bf16 %v172_v16, %v171_v15  ;;  %v257_v20 = vld [vmem:[#allocation8 + $0x10] sm:$0xff]  ;;  %v449_v21 = vpack.c.bf16 %v256_v19, %v255_v18  ;;  %v258_v22 = vld [vmem:[#allocation8 + $0x18] sm:$0xff]  ;;  %v259_v24 = vld [vmem:[#allocation8 + $0x20] sm:$0xff] }
  0x4f   :  { %v452_v23 = vpack.c.bf16 %v258_v22, %v257_v20  ;;  %v260_v25 = vld [vmem:[#allocation8 + $0x28] sm:$0xff]  ;;  %v261_v32 = vld [vmem:[#allocation8 + $0x30] sm:$0xff]  ;;  %v262_v33 = vld [vmem:[#allocation8 + $0x38] sm:$0xff]  ;;  %p565_p7 = por %p564_p6, %p563_p5 }
  0x50   :  { %393 = vmatmul.mubr.msk.f32.vlgmr.msra.gmra.mrb[0].mxu0 %vm90_vm1, %v80_v10  ;;  %v455_v26 = vpack.c.bf16 %v260_v25, %v259_v24  ;;  %v361_v27 = vld [vmem:[%s721_s2] ss:$0 sm:$0xff]  ;;  %v458_v34 = vpack.c.bf16 %v262_v33, %v261_v32 }
  0x51   :  { %430 = vmatprep.mubr.msk.f32.mxu0 %vm595_vm0, %v596_v1  ;;  %441 = vmatpush3.bf16.msra.mxu1 %v440_v11  ;;  %v363_v35 = vld [vmem:[%s723_s4] ss:$0 sm:$0xff]  ;;  %p566_p8 = pnand %p565_p7, %p559_p4 }
  0x52   :  { %442 = vmatprep.subr.bf16.mxu1 %v594_v0  ;;  %450 = vmatpush3.bf16.msra.mxu0 %v449_v21  ;;  %v365_v40 = vld [vmem:[%s725_s6] ss:$0 sm:$0xff] }
  0x53   :  { %451 = vmatprep.subr.bf16.mxu0 %v594_v0 }
  0x55   :  { %444 = vmatpush3.bf16.msra.mxu1 %v443_v14 }
  0x56   :  { %445 = vmatprep.subr.bf16.mxu1 %v594_v0  ;;  %453 = vmatpush3.bf16.msra.mxu0 %v452_v23 }
  0x57   :  { %454 = vmatprep.subr.bf16.mxu0 %v594_v0 }
  0x59   :  { %447 = vmatpush3.bf16.msra.mxu1 %v446_v17 }
  0x5a   :  { %456 = vmatpush3.bf16.msra.mxu0 %v455_v26 }
  0x5b   :  { %457 = vmatprep.subr.bf16.mxu0 %v594_v0 }
  0x5e   :  { %459 = vmatpush3.bf16.msra.mxu0 %v458_v34 }
 0x123   :  { %v160_v28 = vpop.f32.mrb[0].mxu0 }
 0x124   :  { %v161_v29 = vadd.f32 %v361_v27, %v160_v28  ;;  %v394_v30 = vpop.f32.mrb[1].mxu0 }
 0x126   :  { %v164_v31 = vmax.f32 %v161_v29, 0.0 }
 0x128   :  { %412 = vmatmul.mubr.msk.f32.vlgmr.msra.gmra.mrb[0].mxu1 %vm180_vm2, %v164_v31 }
 0x1fb   :  { %v250_v36 = vpop.f32.mrb[0].mxu1 }
 0x1fc   :  { %v251_v37 = vadd.f32 %v363_v35, %v250_v36  ;;  %v413_v38 = vpop.f32.mrb[1].mxu1 }
 0x1fe   :  { %v254_v39 = vmax.f32 %v251_v37, 0.0 }
 0x200   :  { %431 = vmatmul.mubr.msk.f32.vlgmr.msra.gmra.mrb[2].mxu0 %vm180_vm2, %v254_v39 }
 0x2d3   :  { %v339_v41 = vpop.f32.mrb[2].mxu0 }
 0x2d4   :  { %v340_v42 = vadd.f32 %v365_v40, %v339_v41  ;;  %v432_v43 = vpop.f32.mrb[3].mxu0 }
 0x2d6   :  { %343 = vst [vmem:[#allocation10] sm:$0xff] %v340_v42 }
 0x2d7   :  { %569 = shalt.err (!%p566_p8)
}
 0x2d8   :  { %s570_s9 = scalar_lea.hbm %s726_s7, 128 }
 0x2d9   :  { %p571_p9 = scmp.ne.s32.totalorder %s726_s7, %s570_s9  ;;  %p574_p10 = scmp.lt.u32.totalorder %s570_s9, %s726_s7 }
 0x2db   :  { %p576_p11 = pnand %p574_p10, %p571_p9 }
 0x2dd   :  { %579 = shalt.err (!%p576_p11)
}
 0x2de   :  { %353 = dma.vmem_to_hbm [thread:$0]  %s351_s29, 128, %s726_s7, [#allocation4]  }
 0x2df   :  { %586 = dma.done.wait [#allocation4], 128  }
 0x2e0   :  { %587 = vsyncadd [#allocation4], 4294967168 }
 0x2e1   :  { %357 = vsyncpa [#allocation3], 1 }
 0x2e2   :  { %358 = vsyncpa [#allocation6], 1 }
 0x2e3   :  { %359 = vsyncpa [#allocation9], 1 }
 0x2e4   :  { %360 = vsyncpa [#allocation4], 1 }

</bundles_post_ra>
